<compile_context>
chip_gen: v7x
topology: tpu7x:2x2x1
jax: 0.10.0
libtpu: 0.0.40
codegen_flags: <defaults>
</compile_context>

<pallas_src>
import functools

import numpy as np
import jax
import jax.numpy as jnp
from jax.experimental import pallas as pl
from jax.experimental.pallas import tpu as pltpu

_NEG_FILL = -1e30   # class-padding fill: exp(pad - x_t) flushes to 0
_Z_CLAMP = 83.0     # keeps sum_c exp(x_c - x_t) finite for absurd (>e^83) logit gaps


def _round_up(x, m):
    return (x + m - 1) // m * m


def _cdiv(a, b):
    return (a + b - 1) // b


def _pow_one_minus_pt(one_minus_pt, gamma):
    """(1 - pt) ** gamma, specialized at trace time (gamma is a Python float)."""
    if gamma == 0.0:
        return jnp.ones_like(one_minus_pt)
    g_int = int(gamma)
    if float(g_int) == float(gamma) and 1 <= g_int <= 4:
        r = one_minus_pt
        for _ in range(g_int - 1):
            r = r * one_minus_pt
        return r
    # non-integer gamma: exp(gamma * log(x)) on the EUP, with x == 0 handled exactly.
    safe = jnp.maximum(one_minus_pt, 1e-30)
    res = jnp.exp(gamma * jnp.log(safe))
    return jnp.where(one_minus_pt > 0.0, res, 0.0)


def _split_dot(a, b):
    """a @ b with ~f32 accuracy even if the MXU runs bf16 passes.

    `b` is a 0/1 selection matrix (exactly representable in bf16), so only the
    left operand needs a 2-level Dekker split (hi/mid/lo bf16 parts).
    """
    a_hi = a.astype(jnp.bfloat16).astype(jnp.float32)
    rem = a - a_hi
    a_mid = rem.astype(jnp.bfloat16).astype(jnp.float32)
    a_lo = rem - a_mid
    d = lambda u: jnp.dot(u, b, preferred_element_type=jnp.float32)
    return d(a_hi) + d(a_mid) + d(a_lo)


# --------------------------------------------------------------------------- #
# Lane-dense kernel (C <= 32): logits tile is [TR, 128] with 128/C_pad samples
# packed per 128-lane row (sample-major, class-minor; zero-copy reshape).
# --------------------------------------------------------------------------- #
def _focal_lane_dense_kernel(*refs, gamma, batch, has_alpha):
    if has_alpha:
        x_ref, t_ref, eexp_ref, ered_ref, a_ref, out_ref = refs
    else:
        x_ref, t_ref, eexp_ref, ered_ref, out_ref = refs
        a_ref = None
    i = pl.program_id(0)

    x = x_ref[...].astype(jnp.float32)          # [TR, 128]  lane-dense logits
    t = t_ref[...]                              # [TR, S]    int32 targets
    e_exp = eexp_ref[...]                       # [S, 128]   0/1 expand  (resident)
    e_red = ered_ref[...]                       # [128, S]   0/1 reduce  (resident)
    tr = x.shape[0]
    s = t.shape[1]
    c_pad = 128 // s

    lane = jax.lax.broadcasted_iota(jnp.int32, (tr, 128), 1)
    cls = (lane % c_pad).astype(jnp.float32)    # class id of each lane

    # Broadcast each sample's target class to its C_pad lanes (small ints -> exact).
    t_lane = jnp.dot(t.astype(jnp.float32), e_exp, preferred_element_type=jnp.float32)
    onehot = (cls == t_lane).astype(jnp.float32)

    # Target logit per sample, then broadcast back per lane (full f32 fidelity).
    xt_s = _split_dot(x * onehot, e_red)        # [TR, S]
    xt_l = _split_dot(xt_s, e_exp)              # [TR, 128]

    # ce = log(sum_c exp(x_c - x_t)); padded class lanes (-1e30) contribute 0.
    z = jnp.minimum(x - xt_l, _Z_CLAMP)
    ez = jnp.exp(z)                             # dense EUP pass over all logits
    s1 = _split_dot(ez, e_red)                  # [TR, S], >= ~1 for valid samples
    ce = jnp.log(s1)
    pt = 1.0 / s1                               # softmax prob of the target class
    focal = _pow_one_minus_pt(jnp.maximum(1.0 - pt, 0.0), gamma) * ce
    if a_ref is not None:
        focal = focal * a_ref[...].astype(jnp.float32)

    # Mask padded / out-of-bounds samples by GLOBAL sample index (not target value).
    r_io = jax.lax.broadcasted_iota(jnp.int32, (tr, s), 0)
    c_io = jax.lax.broadcasted_iota(jnp.int32, (tr, s), 1)
    gidx = (i * tr + r_io) * s + c_io
    focal = jnp.where(gidx < batch, focal, 0.0)

    out_ref[...] = jnp.sum(focal, axis=0, keepdims=True)   # (1, S) per-block partial


def _focal_small_c(logits, targets, alpha_t, gamma, tile_rows):
    B, C = logits.shape
    itemsize = logits.dtype.itemsize
    has_alpha = alpha_t is not None

    c_pad = 1 << max(0, int(C - 1).bit_length())    # next pow2 >= C (divides 128)
    s = 128 // c_pad                                # samples per 128-lane row

    aligned = (c_pad == C) and (B % s == 0) and (B // s >= 8)
    if aligned:
        b_pad = B
        x_ld = logits.reshape(B // s, 128)          # pure metadata reshape, no HBM copy
    else:
        # One minimal repack copy is unavoidable for a lane-dense view of
        # unaligned shapes (pad classes to pow2, batch to a multiple of S).
        b_pad = max(_round_up(B, s), 8 * s)
        x_ld = jnp.pad(logits, ((0, b_pad - B), (0, c_pad - C)),
                       constant_values=_NEG_FILL).reshape(b_pad // s, 128)
    b_rows = b_pad // s

    t_small = jnp.pad(targets, (0, b_pad - B)).reshape(b_rows, s)
    if has_alpha:
        a_small = jnp.pad(alpha_t, (0, b_pad - B)).reshape(b_rows, s)

    # 0/1 selection matrices: expand per-sample [., S] -> per-lane [., 128] and back.
    lane = np.arange(128)
    e_exp_np = np.zeros((s, 128), np.float32)
    e_exp_np[lane // c_pad, lane] = 1.0
    e_exp = jnp.asarray(e_exp_np)
    e_red = jnp.asarray(np.ascontiguousarray(e_exp_np.T))

    # Tile sizing against the real (lane-padded, double-buffered) VMEM footprint.
    per_row = (2 * 128 * itemsize                        # logits tile, double buffered
               + 2 * 128 * 4 * (2 if has_alpha else 1)   # targets (+alpha), lane padded
               + 8 * 128 * 4)                            # f32 temporaries in the kernel
    if tile_rows is None:
        cap = max(8, min(4096, (12 << 20) // per_row // 8 * 8))
    else:
        cap = max(8, int(tile_rows) // 8 * 8)
    tr = b_rows if b_rows <= cap else cap
    nb = _cdiv(b_rows, tr)

    footprint = tr * per_row + 4 * s * 128 * 4 + (1 << 16)
    vmem_limit = int(min(max(2 * footprint, 24 << 20), 48 << 20))

    kernel = functools.partial(_focal_lane_dense_kernel,
                               gamma=gamma, batch=int(B), has_alpha=has_alpha)

    in_specs = [
        pl.BlockSpec((tr, 128), lambda i: (i, 0)),   # logits, streamed lane-dense
        pl.BlockSpec((tr, s), lambda i: (i, 0)),     # targets
        pl.BlockSpec((s, 128), lambda i: (0, 0)),    # expand matrix (resident)
        pl.BlockSpec((128, s), lambda i: (0, 0)),    # reduce matrix (resident)
    ]
    args = [x_ld, t_small, e_exp, e_red]
    if has_alpha:
        in_specs.append(pl.BlockSpec((tr, s), lambda i: (i, 0)))
        args.append(a_small)

    cost = pl.CostEstimate(
        flops=int(b_rows * 128 * (20 * s + 12)),
        transcendentals=int(b_rows * 128 + 3 * b_rows * s),
        bytes_accessed=int(b_rows * 128 * itemsize
                           + b_rows * s * 4 * (2 if has_alpha else 1) + nb * s * 4),
    )

    partials = pl.pallas_call(
        kernel,
        out_shape=jax.ShapeDtypeStruct((nb, s), jnp.float32),
        grid=(nb,),
        in_specs=in_specs,
        out_specs=pl.BlockSpec((1, s), lambda i: (i, 0)),
        compiler_params=pltpu.CompilerParams(
            dimension_semantics=("parallel",),   # independent blocks -> megacore on v7x
            vmem_limit_bytes=vmem_limit,
        ),
        cost_estimate=cost,
    )(*args)
    return jnp.sum(partials)


# --------------------------------------------------------------------------- #
# Wide-class fallback (C > 32): [TB, C] blocks (lanes are used by C itself).
# --------------------------------------------------------------------------- #
def _focal_wide_kernel(*refs, gamma, batch, has_alpha):
    if has_alpha:
        x_ref, t_ref, a_ref, out_ref = refs
    else:
        x_ref, t_ref, out_ref = refs
        a_ref = None
    i = pl.program_id(0)

    x = x_ref[...].astype(jnp.float32)           # [TB, C]
    t = t_ref[...]                               # [TB, 1] int32
    tb, c = x.shape

    m = jnp.max(x, axis=-1, keepdims=True)
    se = jnp.sum(jnp.exp(x - m), axis=-1, keepdims=True)
    lse = m + jnp.log(se)
    cls = jax.lax.broadcasted_iota(jnp.int32, (tb, c), 1)
    x_t = jnp.sum(jnp.where(cls == t, x, 0.0), axis=-1, keepdims=True)

    ce = lse - x_t
    pt = jnp.exp(-ce)
    focal = _pow_one_minus_pt(jnp.maximum(1.0 - pt, 0.0), gamma) * ce
    if a_ref is not None:
        focal = focal * a_ref[...].astype(jnp.float32)

    rows = i * tb + jax.lax.broadcasted_iota(jnp.int32, (tb, 1), 0)
    focal = jnp.where(rows < batch, focal, 0.0)  # partial last block masked by index
    out_ref[...] = jnp.sum(focal, axis=0, keepdims=True)   # (1, 1) per-block partial


def _focal_wide_c(logits, targets, alpha_t, gamma, tile_rows):
    B, C = logits.shape
    itemsize = logits.dtype.itemsize
    has_alpha = alpha_t is not None

    t2 = targets.reshape(B, 1)
    a2 = alpha_t.reshape(B, 1) if has_alpha else None

    c_lanes = _round_up(C, 128)
    per_row = 2 * c_lanes * itemsize + 2 * 128 * 4 * (2 if has_alpha else 1) + 6 * c_lanes * 4
    if tile_rows is None:
        cap = max(8, min(4096, (12 << 20) // per_row // 8 * 8))
    else:
        cap = max(8, int(tile_rows) // 8 * 8)
    tb = B if B <= cap else cap
    nb = _cdiv(B, tb)
    vmem_limit = int(min(max(2 * tb * per_row, 24 << 20), 48 << 20))

    kernel = functools.partial(_focal_wide_kernel,
                               gamma=gamma, batch=int(B), has_alpha=has_alpha)
    in_specs = [pl.BlockSpec((tb, C), lambda i: (i, 0)),
                pl.BlockSpec((tb, 1), lambda i: (i, 0))]
    args = [logits, t2]
    if has_alpha:
        in_specs.append(pl.BlockSpec((tb, 1), lambda i: (i, 0)))
        args.append(a2)

    partials = pl.pallas_call(
        kernel,
        out_shape=jax.ShapeDtypeStruct((nb, 1), jnp.float32),
        grid=(nb,),
        in_specs=in_specs,
        out_specs=pl.BlockSpec((1, 1), lambda i: (i, 0)),
        compiler_params=pltpu.CompilerParams(
            dimension_semantics=("parallel",),
            vmem_limit_bytes=vmem_limit,
        ),
    )(*args)
    return jnp.sum(partials)


# --------------------------------------------------------------------------- #
# Public wrapper (matches FocalLoss.forward semantics).
# --------------------------------------------------------------------------- #
def focal_loss_pallas(logits, targets, alpha=None, gamma=1.0, reduction='mean',
                      tile_rows=None):
    """logits: [B, C] float (f32 or bf16, streamed as-is); targets: [B] int;
    alpha: per-class weights [C] or None.  Returns the reduced focal loss."""
    B, C = logits.shape
    targets = targets.astype(jnp.int32)

    alpha_t = None
    if alpha is not None:
        alpha_vec = jnp.asarray(alpha, dtype=jnp.float32).reshape(C)
        alpha_t = alpha_vec[targets]          # pre-gathered once: only B*4 extra bytes

    if C <= 32:
        total = _focal_small_c(logits, targets, alpha_t, float(gamma), tile_rows)
    else:
        total = _focal_wide_c(logits, targets, alpha_t, float(gamma), tile_rows)

    if reduction == 'mean':
        return total / B
    if reduction == 'sum':
        return total
    # TODO(synk): reduction='none' (per-sample vector output) is not implemented.
    raise NotImplementedError("reduction='none' is not supported by this Pallas kernel")


def focal_loss_ref(logits, targets, alpha=None, gamma=1.0):
    """Pure-JAX reference matching the PyTorch module (reduction='mean')."""
    logits = logits.astype(jnp.float32)
    lse = jax.nn.logsumexp(logits, axis=-1)
    logit_t = jnp.take_along_axis(logits, targets[:, None].astype(jnp.int32), axis=-1)[:, 0]
    ce = lse - logit_t
    pt = jnp.exp(-ce)
    alpha_t = 1.0 if alpha is None else jnp.asarray(alpha, jnp.float32)[targets]
    return jnp.mean(alpha_t * (1.0 - pt) ** gamma * ce)


if __name__ == "__main__":
    def run_case(key, B, C, gamma, use_alpha, dtype=jnp.float32, tile_rows=None):
        k1, k2 = jax.random.split(key)
        logits = (jax.random.normal(k1, (B, C), dtype=jnp.float32) * 3.0).astype(dtype)
        targets = jax.random.randint(k2, (B,), 0, C, dtype=jnp.int32)
        alpha = jnp.linspace(0.2, 1.0, C, dtype=jnp.float32) if use_alpha else None
        out = jax.block_until_ready(
            focal_loss_pallas(logits, targets, alpha, gamma=gamma, tile_rows=tile_rows))
        ref = focal_loss_ref(logits, targets, alpha, gamma=gamma)
        np.testing.assert_allclose(np.asarray(out), np.asarray(ref), rtol=3e-5, atol=1e-5)

    keys = jax.random.split(jax.random.PRNGKey(0), 5)
    # 1) BERT-head defaults: 4 classes, per-class alpha, gamma=1 (module defaults).
    run_case(keys[0], B=8, C=4, gamma=1.0, use_alpha=True)
    # 2) Unaligned batch, alpha=None, integer-gamma specialization.
    run_case(keys[1], B=13, C=4, gamma=2.0, use_alpha=False)
    # 3) Aligned batch -> zero-copy lane-dense reshape, multi-block parallel grid.
    run_case(keys[2], B=512, C=4, gamma=1.0, use_alpha=True, tile_rows=8)
    # 4) bf16 logits streamed from HBM at half the bytes, upcast inside the kernel.
    run_case(keys[3], B=256, C=4, gamma=2.0, use_alpha=True, dtype=jnp.bfloat16)
    # 5) Wide-class fallback path (C > 32) with non-integer gamma.
    run_case(keys[4], B=24, C=40, gamma=1.5, use_alpha=True)

    print("KERNEL_OK")
</pallas_src>

<mosaic_0001>
module attributes {stable_mosaic.version = 11 : i64} {
  func.func @_focal_lane_dense_kernel(%arg0: i32, %arg1: memref<8x128xf32, #tpu.memory_space<vmem>>, %arg2: memref<8x32xi32, #tpu.memory_space<vmem>>, %arg3: memref<32x128xf32, #tpu.memory_space<vmem>>, %arg4: memref<128x32xf32, #tpu.memory_space<vmem>>, %arg5: memref<8x32xf32, #tpu.memory_space<vmem>>, %arg6: memref<1x32xf32, #tpu.memory_space<vmem>>) attributes {dimension_semantics = [#tpu.dimension_semantics<parallel>], iteration_bounds = array<i64: 1>, scalar_prefetch = 0 : i64, scratch_operands = 0 : i64, tpu.core_type = #tpu.core_type<tc>, window_params = [{transform_indices = @transform_0, window_bounds = array<i64: 8, 128>}, {transform_indices = @transform_1, window_bounds = array<i64: 8, 32>}, {pipeline_mode = #tpu.pipeline_mode<synchronous>, transform_indices = @transform_2, window_bounds = array<i64: 32, 128>}, {pipeline_mode = #tpu.pipeline_mode<synchronous>, transform_indices = @transform_3, window_bounds = array<i64: 128, 32>}, {transform_indices = @transform_4, window_bounds = array<i64: 8, 32>}, {transform_indices = @transform_5, window_bounds = array<i64: 1, 32>}]} {
    %c0 = arith.constant 0 : index
    %c0_0 = arith.constant 0 : index
    %0 = vector.load %arg1[%c0, %c0_0] : memref<8x128xf32, #tpu.memory_space<vmem>>, vector<8x128xf32>
    %c0_1 = arith.constant 0 : index
    %c0_2 = arith.constant 0 : index
    %1 = vector.load %arg2[%c0_1, %c0_2] : memref<8x32xi32, #tpu.memory_space<vmem>>, vector<8x32xi32>
    %c0_3 = arith.constant 0 : index
    %c0_4 = arith.constant 0 : index
    %2 = vector.load %arg3[%c0_3, %c0_4] : memref<32x128xf32, #tpu.memory_space<vmem>>, vector<32x128xf32>
    %c0_5 = arith.constant 0 : index
    %c0_6 = arith.constant 0 : index
    %3 = vector.load %arg4[%c0_5, %c0_6] : memref<128x32xf32, #tpu.memory_space<vmem>>, vector<128x32xf32>
    %4 = tpu.iota {dimensions = array<i32: 1>} : vector<8x128xi32>
    %c4_i32 = arith.constant 4 : i32
    %c0_i32 = arith.constant 0 : i32
    %5 = arith.cmpi eq, %c4_i32, %c0_i32 : i32
    %c1_i32 = arith.constant 1 : i32
    %6 = arith.select %5, %c1_i32, %c4_i32 : i32
    %7 = vector.broadcast %6 : i32 to vector<8x128xi32>
    %8 = arith.remsi %4, %7 : vector<8x128xi32>
    %c0_i32_7 = arith.constant 0 : i32
    %9 = vector.broadcast %c0_i32_7 : i32 to vector<8x128xi32>
    %10 = arith.cmpi ne, %8, %9 : vector<8x128xi32>
    %c0_i32_8 = arith.constant 0 : i32
    %11 = vector.broadcast %c0_i32_8 : i32 to vector<8x128xi32>
    %12 = arith.cmpi slt, %8, %11 : vector<8x128xi32>
    %c0_i32_9 = arith.constant 0 : i32
    %13 = arith.cmpi slt, %6, %c0_i32_9 : i32
    %14 = vector.broadcast %13 : i1 to vector<8x128xi1>
    %15 = vector.broadcast %14 : vector<8x128xi1> to vector<8x128xi1>
    %16 = arith.xori %12, %15 : vector<8x128xi1>
    %17 = arith.andi %16, %10 : vector<8x128xi1>
    %18 = vector.broadcast %6 : i32 to vector<8x128xi32>
    %19 = arith.addi %8, %18 : vector<8x128xi32>
    %20 = arith.select %17, %19, %8 : vector<8x128xi1>, vector<8x128xi32>
    %21 = arith.sitofp %20 : vector<8x128xi32> to vector<8x128xf32>
    %22 = arith.sitofp %1 : vector<8x32xi32> to vector<8x32xf32>
    %cst = arith.constant dense<0.000000e+00> : vector<8x128xf32>
    %23 = tpu.matmul %22, %2, %cst {dimension_numbers = #tpu.dot_dimension_numbers<[1], [0], [0], [1], [0, 0, 1, 1], [], []>} : vector<8x32xf32>, vector<32x128xf32>, vector<8x128xf32> -> vector<8x128xf32>
    %24 = arith.cmpf oeq, %21, %23 : vector<8x128xf32>
    %25 = arith.extui %24 : vector<8x128xi1> to vector<8x128xi32>
    %26 = arith.sitofp %25 : vector<8x128xi32> to vector<8x128xf32>
    %27 = arith.mulf %0, %26 : vector<8x128xf32>
    %28 = arith.truncf %27 : vector<8x128xf32> to vector<8x128xbf16>
    %29 = arith.extf %28 : vector<8x128xbf16> to vector<8x128xf32>
    %30 = arith.subf %27, %29 : vector<8x128xf32>
    %31 = arith.truncf %30 : vector<8x128xf32> to vector<8x128xbf16>
    %32 = arith.extf %31 : vector<8x128xbf16> to vector<8x128xf32>
    %33 = arith.subf %30, %32 : vector<8x128xf32>
    %cst_10 = arith.constant dense<0.000000e+00> : vector<8x32xf32>
    %34 = tpu.matmul %29, %3, %cst_10 {dimension_numbers = #tpu.dot_dimension_numbers<[1], [0], [0], [1], [0, 0, 1, 1], [], []>} : vector<8x128xf32>, vector<128x32xf32>, vector<8x32xf32> -> vector<8x32xf32>
    %cst_11 = arith.constant dense<0.000000e+00> : vector<8x32xf32>
    %35 = tpu.matmul %32, %3, %cst_11 {dimension_numbers = #tpu.dot_dimension_numbers<[1], [0], [0], [1], [0, 0, 1, 1], [], []>} : vector<8x128xf32>, vector<128x32xf32>, vector<8x32xf32> -> vector<8x32xf32>
    %36 = arith.addf %34, %35 : vector<8x32xf32>
    %cst_12 = arith.constant dense<0.000000e+00> : vector<8x32xf32>
    %37 = tpu.matmul %33, %3, %cst_12 {dimension_numbers = #tpu.dot_dimension_numbers<[1], [0], [0], [1], [0, 0, 1, 1], [], []>} : vector<8x128xf32>, vector<128x32xf32>, vector<8x32xf32> -> vector<8x32xf32>
    %38 = arith.addf %36, %37 : vector<8x32xf32>
    %39 = arith.truncf %38 : vector<8x32xf32> to vector<8x32xbf16>
    %40 = arith.extf %39 : vector<8x32xbf16> to vector<8x32xf32>
    %41 = arith.subf %38, %40 : vector<8x32xf32>
    %42 = arith.truncf %41 : vector<8x32xf32> to vector<8x32xbf16>
    %43 = arith.extf %42 : vector<8x32xbf16> to vector<8x32xf32>
    %44 = arith.subf %41, %43 : vector<8x32xf32>
    %cst_13 = arith.constant dense<0.000000e+00> : vector<8x128xf32>
    %45 = tpu.matmul %40, %2, %cst_13 {dimension_numbers = #tpu.dot_dimension_numbers<[1], [0], [0], [1], [0, 0, 1, 1], [], []>} : vector<8x32xf32>, vector<32x128xf32>, vector<8x128xf32> -> vector<8x128xf32>
    %cst_14 = arith.constant dense<0.000000e+00> : vector<8x128xf32>
    %46 = tpu.matmul %43, %2, %cst_14 {dimension_numbers = #tpu.dot_dimension_numbers<[1], [0], [0], [1], [0, 0, 1, 1], [], []>} : vector<8x32xf32>, vector<32x128xf32>, vector<8x128xf32> -> vector<8x128xf32>
    %47 = arith.addf %45, %46 : vector<8x128xf32>
    %cst_15 = arith.constant dense<0.000000e+00> : vector<8x128xf32>
    %48 = tpu.matmul %44, %2, %cst_15 {dimension_numbers = #tpu.dot_dimension_numbers<[1], [0], [0], [1], [0, 0, 1, 1], [], []>} : vector<8x32xf32>, vector<32x128xf32>, vector<8x128xf32> -> vector<8x128xf32>
    %49 = arith.addf %47, %48 : vector<8x128xf32>
    %50 = arith.subf %0, %49 : vector<8x128xf32>
    %cst_16 = arith.constant 8.300000e+01 : f32
    %51 = vector.broadcast %cst_16 : f32 to vector<8x128xf32>
    %52 = arith.minimumf %50, %51 : vector<8x128xf32>
    %53 = math.exp %52 : vector<8x128xf32>
    %54 = arith.truncf %53 : vector<8x128xf32> to vector<8x128xbf16>
    %55 = arith.extf %54 : vector<8x128xbf16> to vector<8x128xf32>
    %56 = arith.subf %53, %55 : vector<8x128xf32>
    %57 = arith.truncf %56 : vector<8x128xf32> to vector<8x128xbf16>
    %58 = arith.extf %57 : vector<8x128xbf16> to vector<8x128xf32>
    %59 = arith.subf %56, %58 : vector<8x128xf32>
    %cst_17 = arith.constant dense<0.000000e+00> : vector<8x32xf32>
    %60 = tpu.matmul %55, %3, %cst_17 {dimension_numbers = #tpu.dot_dimension_numbers<[1], [0], [0], [1], [0, 0, 1, 1], [], []>} : vector<8x128xf32>, vector<128x32xf32>, vector<8x32xf32> -> vector<8x32xf32>
    %cst_18 = arith.constant dense<0.000000e+00> : vector<8x32xf32>
    %61 = tpu.matmul %58, %3, %cst_18 {dimension_numbers = #tpu.dot_dimension_numbers<[1], [0], [0], [1], [0, 0, 1, 1], [], []>} : vector<8x128xf32>, vector<128x32xf32>, vector<8x32xf32> -> vector<8x32xf32>
    %62 = arith.addf %60, %61 : vector<8x32xf32>
    %cst_19 = arith.constant dense<0.000000e+00> : vector<8x32xf32>
    %63 = tpu.matmul %59, %3, %cst_19 {dimension_numbers = #tpu.dot_dimension_numbers<[1], [0], [0], [1], [0, 0, 1, 1], [], []>} : vector<8x128xf32>, vector<128x32xf32>, vector<8x32xf32> -> vector<8x32xf32>
    %64 = arith.addf %62, %63 : vector<8x32xf32>
    %65 = math.log %64 : vector<8x32xf32>
    %cst_20 = arith.constant 1.000000e+00 : f32
    %66 = vector.broadcast %cst_20 : f32 to vector<8x32xf32>
    %67 = arith.divf %66, %64 : vector<8x32xf32>
    %cst_21 = arith.constant 1.000000e+00 : f32
    %68 = vector.broadcast %cst_21 : f32 to vector<8x32xf32>
    %69 = arith.subf %68, %67 : vector<8x32xf32>
    %cst_22 = arith.constant 0.000000e+00 : f32
    %70 = vector.broadcast %cst_22 : f32 to vector<8x32xf32>
    %71 = arith.maximumf %69, %70 : vector<8x32xf32>
    %72 = arith.mulf %71, %65 : vector<8x32xf32>
    %c0_23 = arith.constant 0 : index
    %c0_24 = arith.constant 0 : index
    %73 = vector.load %arg5[%c0_23, %c0_24] : memref<8x32xf32, #tpu.memory_space<vmem>>, vector<8x32xf32>
    %74 = arith.mulf %72, %73 : vector<8x32xf32>
    %75 = tpu.iota {dimensions = array<i32: 0>} : vector<8x32xi32>
    %76 = tpu.iota {dimensions = array<i32: 1>} : vector<8x32xi32>
    %c8_i32 = arith.constant 8 : i32
    %77 = arith.muli %arg0, %c8_i32 : i32
    %78 = vector.broadcast %77 : i32 to vector<8x32xi32>
    %79 = arith.addi %78, %75 : vector<8x32xi32>
    %c32_i32 = arith.constant 32 : i32
    %80 = vector.broadcast %c32_i32 : i32 to vector<8x32xi32>
    %81 = arith.muli %79, %80 : vector<8x32xi32>
    %82 = arith.addi %81, %76 : vector<8x32xi32>
    %c8_i32_25 = arith.constant 8 : i32
    %83 = vector.broadcast %c8_i32_25 : i32 to vector<8x32xi32>
    %84 = arith.cmpi slt, %82, %83 : vector<8x32xi32>
    %cst_26 = arith.constant 0.000000e+00 : f32
    %85 = vector.broadcast %cst_26 : f32 to vector<8x32xf32>
    %86 = arith.select %84, %74, %85 : vector<8x32xi1>, vector<8x32xf32>
    %cst_27 = arith.constant dense<0.000000e+00> : vector<32xf32>
    %87 = vector.multi_reduction <add>, %86, %cst_27 [0] : vector<8x32xf32> to vector<32xf32>
    %88 = vector.shape_cast %87 : vector<32xf32> to vector<1x32xf32>
    %c0_28 = arith.constant 0 : index
    %c0_29 = arith.constant 0 : index
    %89 = vector.load %arg6[%c0_28, %c0_29] : memref<1x32xf32, #tpu.memory_space<vmem>>, vector<1x32xf32>
    tpu.vector_store %arg6[%c0_28, %c0_29], %88 {strides = array<i32>} : memref<1x32xf32, #tpu.memory_space<vmem>>, vector<1x32xf32>,
    return
  }
  func.func @transform_0(%arg0: i32) -> (i32, i32) {
    %c0_i32 = arith.constant 0 : i32
    %c0_i32_0 = arith.constant 0 : i32
    return %arg0, %c0_i32 : i32, i32
  }
  func.func @transform_1(%arg0: i32) -> (i32, i32) {
    %c0_i32 = arith.constant 0 : i32
    %c0_i32_0 = arith.constant 0 : i32
    return %arg0, %c0_i32 : i32, i32
  }
  func.func @transform_2(%arg0: i32) -> (i32, i32) {
    %c0_i32 = arith.constant 0 : i32
    %c0_i32_0 = arith.constant 0 : i32
    %c0_i32_1 = arith.constant 0 : i32
    return %c0_i32, %c0_i32_0 : i32, i32
  }
  func.func @transform_3(%arg0: i32) -> (i32, i32) {
    %c0_i32 = arith.constant 0 : i32
    %c0_i32_0 = arith.constant 0 : i32
    %c0_i32_1 = arith.constant 0 : i32
    return %c0_i32, %c0_i32_0 : i32, i32
  }
  func.func @transform_4(%arg0: i32) -> (i32, i32) {
    %c0_i32 = arith.constant 0 : i32
    %c0_i32_0 = arith.constant 0 : i32
    return %arg0, %c0_i32 : i32, i32
  }
  func.func @transform_5(%arg0: i32) -> (i32, i32) {
    %c0_i32 = arith.constant 0 : i32
    %c0_i32_0 = arith.constant 0 : i32
    return %arg0, %c0_i32 : i32, i32
  }
}

</mosaic_0001>

<bundles_post_ra>
// kernel: tpu_custom_call.1
= control target key start
LH: loop header
LB: loop body
LE: loop exit
PB: predicated region body
PF: predicated region fallthrough
CT: control target
= control target key end

     0   :  { %v1436_v3 = vmov 0.0|0.0   ;;  %vm1437_vm0 = vmmov 0   ;;  %v1438_v6 = vmov 0.0   ;;  %s1719_s0 = inlined_call_operand.vmem [shape: f32[8,128], index: 0, kind: input, shape index: {}]   ;;  %s1720_s1 = inlined_call_operand.vmem [shape: s32[8,32], index: 1, kind: input, shape index: {}]   ;;  %s1721_s2 = inlined_call_operand.vmem [shape: f32[32,128], index: 2, kind: input, shape index: {}]   ;;  %s1722_s3 = inlined_call_operand.vmem [shape: f32[128,32], index: 3, kind: input, shape index: {}]   ;;  %s1723_s4 = inlined_call_operand.vmem [shape: f32[8,32], index: 4, kind: input, shape index: {}]   ;;  %s1724_s5 = inlined_call_operand.hbm [shape: f32[1,32], index: 5, kind: output, shape index: {}]  }
   0x1   :  { %v23_v0 = vld [vmem:[%s1721_s2] sm:$0xff]  ;;  %v24_v1 = vld [vmem:[%s1721_s2 + $0x8] sm:$0xff]  ;;  %v25_v2 = vld [vmem:[%s1721_s2 + $0x10] sm:$0xff]  ;;  %1223 = vmatprep.subr.bf16.mxu1 %v1436_v3  ;;  %977 = vmatprep.mubr.msk.f32.mxu1 %vm1437_vm0, %v1438_v6 }
   0x2   :  { %v1480_v4 = vpack.c.bf16 %v24_v1, %v23_v0  ;;  %v26_v5 = vld [vmem:[%s1721_s2 + $0x18] sm:$0xff]  ;;  %1307 = vmatprep.subr.bf16.mxu0 %v1436_v3  ;;  %1104 = vmatprep.mubr.msk.f32.mxu0 %vm1437_vm0, %v1438_v6  ;;  %v22_v8 = vld [vmem:[%s1720_s1] sm:$0xff]  ;;  %v28_v10 = vld [vmem:[%s1722_s3 + $0x8] sm:$0xff] }
   0x3   :  { %v1491_v7 = vpack.c.bf16 %v26_v5, %v25_v2  ;;  %v27_v9 = vld [vmem:[%s1722_s3] sm:$0xff] }
   0x4   :  { %1225 = vmatpush3.bf16.msra.mxu1 %v1480_v4  ;;  %1309 = vmatpush3.bf16.msra.mxu0 %v1480_v4 }
   0x5   :  { %1226 = vmatprep.subr.bf16.mxu1 %v1436_v3  ;;  %1310 = vmatprep.subr.bf16.mxu0 %v1436_v3 }
   0x6   :  { %10 = vsyncpa [#allocation3], 0  ;;  %v58_v11 = vcvt.s32.f32 %v22_v8  ;;  %vm59_vm1 = vcmask 261120   ;;  %v1506_v12 = vpack.c.bf16 %v28_v10, %v27_v9  ;;  %v29_v13 = vld [vmem:[%s1722_s3 + $0x10] sm:$0xff]  ;;  %v30_v14 = vld [vmem:[%s1722_s3 + $0x18] sm:$0xff]  ;;  %v43_v34 = vlaneseq  ;;  %s1439_s8 = smov [#allocation2]  }
   0x7   :  { %v1519_v15 = vpack.c.bf16 %v30_v14, %v29_v13  ;;  %v31_v16 = vld [vmem:[%s1722_s3 + $0x20] sm:$0xff]  ;;  %v32_v17 = vld [vmem:[%s1722_s3 + $0x28] sm:$0xff]  ;;  %v33_v19 = vld [vmem:[%s1722_s3 + $0x30] sm:$0xff]  ;;  %s834_s9 = sshll.u32 %s1439_s8, 4  ;;  %vm826_vm4 = vcmask 253952   ;;  %s835_s9 = int_to_ptr.vmem [resolvable:$true] %s834_s9 }
   0x8   :  { %1228 = vmatpush3.bf16.msra.mxu1 %v1491_v7  ;;  %1312 = vmatpush3.bf16.msra.mxu0 %v1491_v7  ;;  %v1531_v18 = vpack.c.bf16 %v32_v17, %v31_v16  ;;  %v34_v20 = vld [vmem:[%s1722_s3 + $0x38] sm:$0xff]  ;;  %v35_v22 = vld [vmem:[%s1722_s3 + $0x40] sm:$0xff]  ;;  %v36_v23 = vld [vmem:[%s1722_s3 + $0x48] sm:$0xff]  ;;  %v1587_v35 = vand.u32 127, %v43_v34  ;;  %s1412_s10 = scalar_lea.vmem %s835_s9, 16  ;;  %p1417_p1 = scmp.lt.s32.totalorder %s835_s9, %s835_s9 }
   0x9   :  { %1229 = vmatprep.subr.bf16.mxu1 %v1436_v3  ;;  %1313 = vmatprep.subr.bf16.mxu0 %v1436_v3  ;;  %v1541_v21 = vpack.c.bf16 %v34_v20, %v33_v19  ;;  %v1551_v24 = vpack.c.bf16 %v36_v23, %v35_v22  ;;  %v37_v25 = vld [vmem:[%s1722_s3 + $0x50] sm:$0xff]  ;;  %v38_v26 = vld [vmem:[%s1722_s3 + $0x58] sm:$0xff]  ;;  %v39_v28 = vld [vmem:[%s1722_s3 + $0x60] sm:$0xff]  ;;  %p1413_p0 = scmp.ne.s32.totalorder %s835_s9, %s1412_s10 }
   0xa   :  { %v1562_v27 = vpack.c.bf16 %v38_v26, %v37_v25  ;;  %v40_v29 = vld [vmem:[%s1722_s3 + $0x68] sm:$0xff]  ;;  %v41_v31 = vld [vmem:[%s1722_s3 + $0x70] sm:$0xff]  ;;  %v42_v32 = vld [vmem:[%s1722_s3 + $0x78] sm:$0xff]  ;;  %v49_v36 = vand.u32 3, %v1587_v35 }
   0xb   :  { %978 = vmatmul.mubr.msk.f32.vlgmr.msra.gmra.mrb[0].mxu1 %vm59_vm1, %v58_v11  ;;  %v1572_v30 = vpack.c.bf16 %v40_v29, %v39_v28  ;;  %v1582_v33 = vpack.c.bf16 %v42_v32, %v41_v31  ;;  %v1593_v38 = vld [vmem:[%s1719_s0] sm:$0xff]  ;;  %v811_v11 = vshrl.u32 %v43_v34, 7 }
   0xc   :  { %1231 = vmatpush3.bf16.msra.mxu1 %v1506_v12  ;;  %1012 = vmatprep.mubr.msk.f32.mxu1 %vm1437_vm0, %v1438_v6  ;;  %v57_v37 = vcvt.s32.f32 %v49_v36 }
   0xd   :  { %1232 = vmatprep.subr.bf16.mxu1 %v1436_v3 }
  0x10   :  { %1234 = vmatpush3.bf16.msra.mxu1 %v1519_v15 }
  0x11   :  { %1235 = vmatprep.subr.bf16.mxu1 %v1436_v3 }
  0x14   :  { %1237 = vmatpush3.bf16.msra.mxu1 %v1531_v18 }
  0x15   :  { %1238 = vmatprep.subr.bf16.mxu1 %v1436_v3 }
  0x18   :  { %1240 = vmatpush3.bf16.msra.mxu1 %v1541_v21 }
  0x19   :  { %1241 = vmatprep.subr.bf16.mxu1 %v1436_v3 }
  0x1c   :  { %1243 = vmatpush3.bf16.msra.mxu1 %v1551_v24 }
  0x1d   :  { %1244 = vmatprep.subr.bf16.mxu1 %v1436_v3 }
  0x20   :  { %1246 = vmatpush3.bf16.msra.mxu1 %v1562_v27 }
  0x21   :  { %1247 = vmatprep.subr.bf16.mxu1 %v1436_v3 }
  0x24   :  { %1249 = vmatpush3.bf16.msra.mxu1 %v1572_v30 }
  0x25   :  { %1250 = vmatprep.subr.bf16.mxu1 %v1436_v3 }
  0x28   :  { %1252 = vmatpush3.bf16.msra.mxu1 %v1582_v33 }
  0x29   :  { %1253 = vmatprep.subr.bf16.mxu1 %v1436_v3 }
  0xde   :  { %v129_v39 = vpop.f32.mrb[0].mxu1 }
  0xdf   :  { %vm133_vm2 = vcmp.eq.f32.partialorder %v57_v37, %v129_v39  ;;  %v979_v40 = vpop.f32.mrb[1].mxu1 }
  0xe0   :  { %v843_v41 = vsel %vm133_vm2, 1.0, %v1438_v6 }
  0xe1   :  { %v136_v42 = vmul.f32 %v843_v41, %v1593_v38 }
  0xe3   :  { %v137_v43 = vpack.c.bf16 %v136_v42, %v136_v42 }
  0xe5   :  { %v138_v44 = vunpack.c.l.bf16 %v137_v43 }
  0xe7   :  { %v139_v45 = vsub.f32 %v136_v42, %v138_v44 }
  0xe9   :  { %v140_v46 = vpack.c.bf16 %v139_v45, %v139_v45 }
  0xeb   :  { %v141_v47 = vunpack.c.l.bf16 %v140_v46 }
  0xed   :  { %v142_v48 = vsub.f32 %v139_v45, %v141_v47  ;;  %1013 = vmatmul.mubr.f32.vlgmr.msra.gmra.mrb[2].mxu1 %v141_v47 }
  0xee   :  { %1255 = vmatpush3.bf16.msra.mxu1 %v1506_v12  ;;  %1047 = vmatprep.mubr.msk.f32.mxu1 %vm1437_vm0, %v1438_v6 }
  0xef   :  { %1256 = vmatprep.subr.bf16.mxu1 %v1436_v3 }
  0xf2   :  { %1258 = vmatpush3.bf16.msra.mxu1 %v1519_v15 }
  0xf3   :  { %1259 = vmatprep.subr.bf16.mxu1 %v1436_v3 }
  0xf6   :  { %1261 = vmatpush3.bf16.msra.mxu1 %v1531_v18 }
  0xf7   :  { %1262 = vmatprep.subr.bf16.mxu1 %v1436_v3 }
  0xfa   :  { %1264 = vmatpush3.bf16.msra.mxu1 %v1541_v21 }
  0xfb   :  { %1265 = vmatprep.subr.bf16.mxu1 %v1436_v3 }
  0xfe   :  { %1267 = vmatpush3.bf16.msra.mxu1 %v1551_v24 }
  0xff   :  { %1268 = vmatprep.subr.bf16.mxu1 %v1436_v3 }
 0x102   :  { %1270 = vmatpush3.bf16.msra.mxu1 %v1562_v27 }
 0x103   :  { %1271 = vmatprep.subr.bf16.mxu1 %v1436_v3 }
 0x106   :  { %1273 = vmatpush3.bf16.msra.mxu1 %v1572_v30 }
 0x107   :  { %1274 = vmatprep.subr.bf16.mxu1 %v1436_v3 }
 0x10a   :  { %1276 = vmatpush3.bf16.msra.mxu1 %v1582_v33 }
 0x10b   :  { %1277 = vmatprep.subr.bf16.mxu1 %v1436_v3 }
 0x10d   :  { %1048 = vmatmul.mubr.f32.vlgmr.msra.gmra.mrb[2].mxu1 %v138_v44 }
 0x10e   :  { %1279 = vmatpush3.bf16.msra.mxu1 %v1506_v12  ;;  %1082 = vmatprep.mubr.msk.f32.mxu1 %vm1437_vm0, %v1438_v6 }
 0x10f   :  { %1280 = vmatprep.subr.bf16.mxu1 %v1436_v3 }
 0x112   :  { %1282 = vmatpush3.bf16.msra.mxu1 %v1519_v15 }
 0x113   :  { %1283 = vmatprep.subr.bf16.mxu1 %v1436_v3 }
 0x116   :  { %1285 = vmatpush3.bf16.msra.mxu1 %v1531_v18 }
 0x117   :  { %1286 = vmatprep.subr.bf16.mxu1 %v1436_v3 }
 0x11a   :  { %1288 = vmatpush3.bf16.msra.mxu1 %v1541_v21 }
 0x11b   :  { %1289 = vmatprep.subr.bf16.mxu1 %v1436_v3 }
 0x11e   :  { %1291 = vmatpush3.bf16.msra.mxu1 %v1551_v24 }
 0x11f   :  { %1292 = vmatprep.subr.bf16.mxu1 %v1436_v3 }
 0x122   :  { %1294 = vmatpush3.bf16.msra.mxu1 %v1562_v27 }
 0x123   :  { %1295 = vmatprep.subr.bf16.mxu1 %v1436_v3 }
 0x126   :  { %1297 = vmatpush3.bf16.msra.mxu1 %v1572_v30 }
 0x127   :  { %1298 = vmatprep.subr.bf16.mxu1 %v1436_v3 }
 0x12a   :  { %1300 = vmatpush3.bf16.msra.mxu1 %v1582_v33 }
 0x12b   :  { %1301 = vmatprep.subr.bf16.mxu1 %v1436_v3 }
 0x12d   :  { %1083 = vmatmul.mubr.f32.vlgmr.msra.gmra.mrb[2].mxu1 %v142_v48 }
 0x12e   :  { %1303 = vmatpush3.bf16.msra.mxu1 %v1480_v4  ;;  %1093 = vmatprep.mubr.msk.f32.mxu1 %vm1437_vm0, %v1438_v6 }
 0x12f   :  { %1304 = vmatprep.subr.bf16.mxu1 %v1436_v3 }
 0x132   :  { %1306 = vmatpush3.bf16.msra.mxu1 %v1491_v7 }
 0x200   :  { %v349_v49 = vpop.f32.mrb[2].mxu1 }
 0x201   :  { %v354_v50 = vpack.c.bf16 %v349_v49, %v349_v49  ;;  %v1084_v51 = vpop.f32.mrb[3].mxu1 }
 0x203   :  { %v355_v52 = vunpack.c.l.bf16 %v354_v50 }
 0x205   :  { %v356_v53 = vsub.f32 %v349_v49, %v355_v52  ;;  %1105 = vmatmul.mubr.msk.f32.vlgmr.msra.gmra.mrb[0].mxu0 %vm59_vm1, %v355_v52 }
 0x206   :  { %1315 = vmatpush3.bf16.msra.mxu0 %v1480_v4  ;;  %1115 = vmatprep.mubr.msk.f32.mxu0 %vm1437_vm0, %v1438_v6 }
 0x207   :  { %v357_v54 = vpack.c.bf16 %v356_v53, %v356_v53  ;;  %1316 = vmatprep.subr.bf16.mxu0 %v1436_v3 }
 0x209   :  { %v358_v55 = vunpack.c.l.bf16 %v357_v54 }
 0x20a   :  { %1318 = vmatpush3.bf16.msra.mxu0 %v1491_v7 }
 0x20b   :  { %v359_v56 = vsub.f32 %v356_v53, %v358_v55  ;;  %1094 = vmatmul.mubr.msk.f32.vlgmr.msra.gmra.mrb[4].mxu1 %vm59_vm1, %v358_v55  ;;  %1319 = vmatprep.subr.bf16.mxu0 %v1436_v3 }
 0x20d   :  { %1116 = vmatmul.mubr.msk.f32.vlgmr.msra.gmra.mrb[0].mxu0 %vm59_vm1, %v359_v56 }
 0x20e   :  { %1321 = vmatpush3.bf16.msra.mxu0 %v1506_v12  ;;  %1150 = vmatprep.mubr.msk.f32.mxu0 %vm1437_vm0, %v1438_v6 }
 0x20f   :  { %1322 = vmatprep.subr.bf16.mxu0 %v1436_v3 }
 0x212   :  { %1324 = vmatpush3.bf16.msra.mxu0 %v1519_v15 }
 0x213   :  { %1325 = vmatprep.subr.bf16.mxu0 %v1436_v3 }
 0x216   :  { %1327 = vmatpush3.bf16.msra.mxu0 %v1531_v18 }
 0x217   :  { %1328 = vmatprep.subr.bf16.mxu0 %v1436_v3 }
 0x21a   :  { %1330 = vmatpush3.bf16.msra.mxu0 %v1541_v21 }
 0x21b   :  { %1331 = vmatprep.subr.bf16.mxu0 %v1436_v3 }
 0x21e   :  { %1333 = vmatpush3.bf16.msra.mxu0 %v1551_v24 }
 0x21f   :  { %1334 = vmatprep.subr.bf16.mxu0 %v1436_v3 }
 0x222   :  { %1336 = vmatpush3.bf16.msra.mxu0 %v1562_v27 }
 0x223   :  { %1337 = vmatprep.subr.bf16.mxu0 %v1436_v3 }
 0x226   :  { %1339 = vmatpush3.bf16.msra.mxu0 %v1572_v30 }
 0x227   :  { %1340 = vmatprep.subr.bf16.mxu0 %v1436_v3 }
 0x22a   :  { %1342 = vmatpush3.bf16.msra.mxu0 %v1582_v33 }
 0x22b   :  { %1343 = vmatprep.subr.bf16.mxu0 %v1436_v3 }
 0x2de   :  { %v429_v57 = vpop.f32.mrb[4].mxu1 }
 0x2df   :  { %v1095_v58 = vpop.f32.mrb[5].mxu1 }
 0x2e0   :  { %v575_v59 = vpop.f32.mrb[0].mxu0 }
 0x2e1   :  { %v1391_v60 = vadd.f32 %v575_v59, %v429_v57  ;;  %v1117_v61 = vpop.f32.mrb[1].mxu0 }
 0x2e3   :  { %v580_v62 = vsub.f32 %v1593_v38, %v1391_v60 }
 0x2e5   :  { %v581_v63 = vmin.f32 %v580_v62, 83.0 }
 0x2e7   :  { %v582_v0 = vmul.f32 1.442695, %v581_v63 }
 0x2e9   :  { %1406 = vpow2.f32 %v582_v0 }
 0x2f3   :  { %v1407_v1 = vpop.eup %1406 }
 0x2f4   :  { %v584_v2 = vpack.c.bf16 %v1407_v1, %v1407_v1 }
 0x2f6   :  { %v585_v4 = vunpack.c.l.bf16 %v584_v2 }
 0x2f8   :  { %v586_v5 = vsub.f32 %v1407_v1, %v585_v4 }
 0x2fa   :  { %v587_v7 = vpack.c.bf16 %v586_v5, %v586_v5 }
 0x2fc   :  { %v588_v8 = vunpack.c.l.bf16 %v587_v7 }
 0x2fe   :  { %1151 = vmatmul.mubr.f32.vlgmr.msra.gmra.mrb[2].mxu0 %v588_v8  ;;  %v589_v9 = vsub.f32 %v586_v5, %v588_v8 }
 0x2ff   :  { %1345 = vmatpush3.bf16.msra.mxu0 %v1506_v12  ;;  %1185 = vmatprep.mubr.msk.f32.mxu0 %vm1437_vm0, %v1438_v6 }
 0x300   :  { %1346 = vmatprep.subr.bf16.mxu0 %v1436_v3 }
 0x303   :  { %1348 = vmatpush3.bf16.msra.mxu0 %v1519_v15 }
 0x304   :  { %1349 = vmatprep.subr.bf16.mxu0 %v1436_v3 }
 0x307   :  { %1351 = vmatpush3.bf16.msra.mxu0 %v1531_v18 }
 0x308   :  { %1352 = vmatprep.subr.bf16.mxu0 %v1436_v3 }
 0x30b   :  { %1354 = vmatpush3.bf16.msra.mxu0 %v1541_v21 }
 0x30c   :  { %1355 = vmatprep.subr.bf16.mxu0 %v1436_v3 }
 0x30f   :  { %1357 = vmatpush3.bf16.msra.mxu0 %v1551_v24 }
 0x310   :  { %1358 = vmatprep.subr.bf16.mxu0 %v1436_v3 }
 0x313   :  { %1360 = vmatpush3.bf16.msra.mxu0 %v1562_v27 }
 0x314   :  { %1361 = vmatprep.subr.bf16.mxu0 %v1436_v3 }
 0x317   :  { %1363 = vmatpush3.bf16.msra.mxu0 %v1572_v30 }
 0x318   :  { %1364 = vmatprep.subr.bf16.mxu0 %v1436_v3 }
 0x31b   :  { %1366 = vmatpush3.bf16.msra.mxu0 %v1582_v33 }
 0x31c   :  { %1367 = vmatprep.subr.bf16.mxu0 %v1436_v3 }
 0x31e   :  { %1186 = vmatmul.mubr.f32.vlgmr.msra.gmra.mrb[2].mxu0 %v585_v4 }
 0x31f   :  { %1369 = vmatpush3.bf16.msra.mxu0 %v1506_v12  ;;  %1220 = vmatprep.mubr.msk.f32.mxu0 %vm1437_vm0, %v1438_v6  ;;  %v815_v12 = vmul.u32 32, %v811_v11 }
 0x320   :  { %1370 = vmatprep.subr.bf16.mxu0 %v1436_v3 }
 0x321   :  { %v816_v16 = vadd.s32 %v815_v12, %v1587_v35 }
 0x323   :  { %1372 = vmatpush3.bf16.msra.mxu0 %v1519_v15  ;;  %vm817_vm3 = vcmp.lt.s32.totalorder %v816_v16, 8 }
 0x324   :  { %1373 = vmatprep.subr.bf16.mxu0 %v1436_v3 }
 0x327   :  { %1375 = vmatpush3.bf16.msra.mxu0 %v1531_v18 }
 0x328   :  { %1376 = vmatprep.subr.bf16.mxu0 %v1436_v3 }
 0x32b   :  { %1378 = vmatpush3.bf16.msra.mxu0 %v1541_v21 }
 0x32c   :  { %1379 = vmatprep.subr.bf16.mxu0 %v1436_v3 }
 0x32f   :  { %1381 = vmatpush3.bf16.msra.mxu0 %v1551_v24 }
 0x330   :  { %1382 = vmatprep.subr.bf16.mxu0 %v1436_v3 }
 0x333   :  { %1384 = vmatpush3.bf16.msra.mxu0 %v1562_v27 }
 0x334   :  { %1385 = vmatprep.subr.bf16.mxu0 %v1436_v3 }
 0x337   :  { %1387 = vmatpush3.bf16.msra.mxu0 %v1572_v30 }
 0x338   :  { %1388 = vmatprep.subr.bf16.mxu0 %v1436_v3  ;;  %v808_v3 = vld [vmem:[%s1723_s4] sm:$0xff]  ;;  %s1416_s4 = scalar_lea.vmem %s835_s9, 32 }
 0x339   :  { %p1418_p2 = scmp.lt.s32.totalorder %s1416_s4, %s1412_s10 }
 0x33b   :  { %1390 = vmatpush3.bf16.msra.mxu0 %v1582_v33  ;;  %p1419_p3 = por %p1418_p2, %p1417_p1 }
 0x33d   :  { %p1420_p4 = pnand %p1419_p3, %p1413_p0 }
 0x33e   :  { %1221 = vmatmul.mubr.f32.vlgmr.msra.gmra.mrb[2].mxu0 %v589_v9 }
 0x411   :  { %v796_v6 = vpop.f32.mrb[2].mxu0 }
 0x412   :  { %1408 = vlog2.f32 %v796_v6  ;;  %v1222_v10 = vpop.f32.mrb[3].mxu0 }
 0x413   :  { %1410 = vrcp.f32 %v796_v6 }
 0x41c   :  { %v1409_v13 = vpop.eup %1408 }
 0x41d   :  { %v1411_v14 = vpop.eup %1410  ;;  %v802_v17 = vmul.f32 0.6931472, %v1409_v13 }
 0x41e   :  { %v805_v15 = vsub.f32 1.0, %v1411_v14 }
 0x420   :  { %v806_v18 = vmax.f32 %v805_v15, 0.0 }
 0x422   :  { %v807_v19 = vmul.f32 %v806_v18, %v802_v17 }
 0x424   :  { %v809_v20 = vmul.f32 %v808_v3, %v807_v19 }
 0x426   :  { %v818_v21 = vsel %vm817_vm3, %v809_v20, 0.0 }
 0x427   :  { %v819_v22 = vsel %vm59_vm1, %v818_v21, 0.0 }
 0x428   :  { %v820_v23 = vrot.slane %v819_v22, 4 }
 0x42a   :  { %v821_v24 = vadd.f32 %v820_v23, %v819_v22 }
 0x42c   :  { %v822_v25 = vrot.slane %v821_v24, 2 }
 0x42e   :  { %v823_v26 = vadd.f32 %v822_v25, %v821_v24 }
 0x430   :  { %v824_v27 = vrot.slane %v823_v26, 1 }
 0x432   :  { %v825_v28 = vadd.f32 %v824_v27, %v823_v26 }
 0x434   :  { %827 = vst.msk [vmem:[#allocation2] sm:$0x1] %vm826_vm4, %v825_v28 }
 0x435   :  { %1423 = shalt.err (!%p1420_p4)
}
 0x436   :  { %s1424_s13 = scalar_lea.hbm %s1724_s5, 16 }
 0x437   :  { %p1425_p5 = scmp.ne.s32.totalorder %s1724_s5, %s1424_s13  ;;  %p1428_p6 = scmp.lt.u32.totalorder %s1424_s13, %s1724_s5 }
 0x439   :  { %p1430_p7 = pnand %p1428_p6, %p1425_p5 }
 0x43b   :  { %1433 = shalt.err (!%p1430_p7)
}
 0x43c   :  { %837 = dma.vmem_to_hbm [thread:$0]  %s835_s9, 16, %s1724_s5, [#allocation3]  }
 0x43d   :  { %1434 = dma.done.wait [#allocation3], 16  }
 0x43e   :  { %1435 = vsyncadd [#allocation3], 4294967280 }
 0x43f   :  { %841 = vsyncpa [#allocation3], 1 }

</bundles_post_ra>
